<compile_context>
chip_gen: v7x
topology: tpu7x:2x2x1
jax: 0.10.0
libtpu: 0.0.40
codegen_flags: <defaults>
</compile_context>

<pallas_src>
import functools

import jax
import jax.numpy as jnp
from jax.experimental import pallas as pl
from jax.experimental.pallas import tpu as pltpu


# ----------------------------------------------------------------------------
# Pallas kernel: fused 1x1-conv (channel matmul) + BN scale/shift + SiLU
# channels on sublanes, pixels on lanes -> lane-dense stores
# ----------------------------------------------------------------------------
def _conv1x1_bn_silu_kernel(x_ref, w_ref, scale_ref, shift_ref, o_ref):
    # x_ref:     (C_in,  TP)   bf16 pixel columns (lane axis = pixels)
    # w_ref:     (C_out, C_in) bf16 1x1 conv weight
    # scale_ref: (C_out, 1)    f32 folded BN scale = gamma / sqrt(var + eps)
    # shift_ref: (C_out, 1)    f32 folded BN shift = beta - mean * scale
    # o_ref:     (C_out, TP)   f32
    z = jnp.dot(w_ref[...], x_ref[...], preferred_element_type=jnp.float32)
    z = z * scale_ref[...] + shift_ref[...]          # f32 epilogue (v5e-safe)
    o_ref[...] = (z * jax.nn.sigmoid(z)).astype(o_ref.dtype)   # SiLU


def _pick_tile_p(padded_p, n_batch, c_in, c_out, in_itemsize, out_itemsize,
                 vmem_budget_bytes=12 * 1024 * 1024, max_lanes=8192):
    """Largest 128-multiple tile of pixels that divides padded_p, fits the
    VMEM budget (double-buffered in + out), and keeps >= 2 grid steps."""
    n_blocks = padded_p // 128
    per_px = 2 * (c_in * in_itemsize + c_out * out_itemsize)  # dbl-buffered
    cap = max(1, min(max_lanes // 128, vmem_budget_bytes // (per_px * 128)))
    if n_batch < 2 and n_blocks >= 2:
        cap = min(cap, n_blocks // 2)     # keep >= 2 steps (v7x: 2 TensorCores)
    cap = max(1, min(cap, n_blocks))
    best = 1
    for d in range(1, cap + 1):           # divisor -> zero pad waste
        if n_blocks % d == 0:
            best = d
    return best * 128


@functools.partial(jax.jit, static_argnames=("tile_p",))
def conv1x1_bn_silu(x_cols, w, scale, shift, *, tile_p):
    """x_cols: (N, C_in, P) bf16, P % tile_p == 0; returns (N, C_out, P) f32."""
    N, C_in, P = x_cols.shape
    C_out = w.shape[0]
    grid = (N, P // tile_p)
    return pl.pallas_call(
        _conv1x1_bn_silu_kernel,
        out_shape=jax.ShapeDtypeStruct((N, C_out, P), jnp.float32),
        grid_spec=pltpu.PrefetchScalarGridSpec(
            num_scalar_prefetch=0,
            grid=grid,
            in_specs=[
                pl.BlockSpec((None, C_in, tile_p), lambda n, p: (n, 0, p)),
                pl.BlockSpec((C_out, C_in), lambda n, p: (0, 0)),
                pl.BlockSpec((C_out, 1), lambda n, p: (0, 0)),
                pl.BlockSpec((C_out, 1), lambda n, p: (0, 0)),
            ],
            out_specs=pl.BlockSpec((None, C_out, tile_p), lambda n, p: (n, 0, p)),
        ),
        compiler_params=pltpu.CompilerParams(
            dimension_semantics=("parallel", "parallel"),
            vmem_limit_bytes=32 * 1024 * 1024,
        ),
    )(x_cols, w, scale, shift)


# ----------------------------------------------------------------------------
# Bilinear resize (torchvision bilinear, align_corners=False, no antialias)
# expressed as separable interpolation matrices -- plain-JAX glue.
# ----------------------------------------------------------------------------
def _bilinear_matrix(out_size, in_size):
    i = jnp.arange(out_size, dtype=jnp.float32)
    src = (i + 0.5) * (in_size / out_size) - 0.5
    src = jnp.maximum(src, 0.0)            # PyTorch clamps source index to 0
    i0 = jnp.floor(src).astype(jnp.int32)
    lam = src - i0.astype(jnp.float32)
    i0 = jnp.clip(i0, 0, in_size - 1)
    i1 = jnp.clip(i0 + 1, 0, in_size - 1)
    oh0 = jax.nn.one_hot(i0, in_size, dtype=jnp.float32) * (1.0 - lam)[:, None]
    oh1 = jax.nn.one_hot(i1, in_size, dtype=jnp.float32) * lam[:, None]
    return oh0 + oh1                        # (out_size, in_size)


def bilinear_resize_nchw(x, out_hw):
    H_out, W_out = out_hw
    Rh = _bilinear_matrix(H_out, x.shape[-2])   # (H_out, H_in)
    Rw = _bilinear_matrix(W_out, x.shape[-1])   # (W_out, W_in)
    x = jnp.einsum("ah,nchw->ncaw", Rh, x)
    x = jnp.einsum("bw,ncaw->ncab", Rw, x)
    return x                                     # (N, C, H_out, W_out)


# ----------------------------------------------------------------------------
# Dech_block wrapper (NCHW in / NCHW out, matching PyTorch)
# ----------------------------------------------------------------------------
@jax.jit
def dech_block_forward(x, y, params):
    H_y, W_y = int(y.shape[-2]), int(y.shape[-1])
    xr = bilinear_resize_nchw(x, (H_y, W_y))            # (N, C_in, H_y, W_y) f32

    N, C_in, H, W = xr.shape
    P = H * W
    C_out = params["w"].shape[0]

    # pixels onto the lane axis (free reshape in NCHW); stream bf16
    x_cols = xr.reshape(N, C_in, P).astype(jnp.bfloat16)
    P_pad = ((P + 127) // 128) * 128
    if P_pad != P:
        x_cols = jnp.pad(x_cols, ((0, 0), (0, 0), (0, P_pad - P)))

    tile_p = _pick_tile_p(P_pad, N, C_in, C_out, in_itemsize=2, out_itemsize=4)

    out_cols = conv1x1_bn_silu(
        x_cols, params["w_bf16"], params["scale"], params["shift"], tile_p=tile_p)

    return out_cols[:, :, :P].reshape(N, C_out, H, W)   # NCHW, f32


def make_params(key, x_ch, y_ch, eps=1e-3):   # module spec: BatchNorm2d(eps=0.001)
    kw, kg, kb, km, kv = jax.random.split(key, 5)
    # Conv2d(x_ch, y_ch, 1, bias=False) weight: (y_ch, x_ch, 1, 1) -> (C_out, C_in)
    w_conv = jax.random.normal(kw, (y_ch, x_ch, 1, 1), jnp.float32) * 0.1
    w = w_conv[:, :, 0, 0]                               # (C_out, C_in)
    # BatchNorm2d params / running stats (eval-mode, folded to scale/shift)
    gamma = 1.0 + 0.1 * jax.random.normal(kg, (y_ch,), jnp.float32)
    beta = 0.1 * jax.random.normal(kb, (y_ch,), jnp.float32)
    running_mean = 0.05 * jax.random.normal(km, (y_ch,), jnp.float32)
    running_var = 1.0 + 0.1 * jax.random.uniform(kv, (y_ch,), jnp.float32)
    scale = gamma / jnp.sqrt(running_var + eps)
    shift = beta - running_mean * scale
    return {
        "w": w,                                 # f32 reference weight
        "w_bf16": w.astype(jnp.bfloat16),       # streamed into the kernel
        "scale": scale[:, None],                # (C_out, 1)
        "shift": shift[:, None],                # (C_out, 1)
    }


def reference_forward(x, y, params, *, matmul_dtype=jnp.float32):
    xr = bilinear_resize_nchw(x, (y.shape[-2], y.shape[-1]))
    z = jnp.einsum("nchw,dc->ndhw",
                   xr.astype(matmul_dtype), params["w"].astype(matmul_dtype),
                   preferred_element_type=jnp.float32)
    z = z * params["scale"][None, :, :, None] + params["shift"][None, :, :, None]
    return z * jax.nn.sigmoid(z)


if __name__ == "__main__":
    key = jax.random.PRNGKey(0)
    k_x, k_y, k_p = jax.random.split(key, 3)

    x_ch, y_ch, out_ch = 4, 8, 8          # out_ch unused by the module's forward
    x = jax.random.normal(k_x, (2, x_ch, 8, 8), jnp.float32)     # NCHW
    y = jax.random.normal(k_y, (2, y_ch, 16, 16), jnp.float32)   # NCHW spatial target

    params = make_params(k_p, x_ch, y_ch)

    out = jax.block_until_ready(dech_block_forward(x, y, params))
    assert out.shape == (2, y_ch, 16, 16)

    # tight check vs a reference using the same bf16 operand streaming
    ref_bf16 = jax.block_until_ready(
        reference_forward(x, y, params, matmul_dtype=jnp.bfloat16))
    assert jnp.allclose(out, ref_bf16, atol=1e-3, rtol=1e-3)

    # loose check vs full-f32 (PyTorch-faithful) math: bounds bf16 stream error
    ref_f32 = jax.block_until_ready(reference_forward(x, y, params))
    assert jnp.allclose(out, ref_f32, atol=5e-2, rtol=5e-2)

    print("KERNEL_OK")
</pallas_src>

<mosaic_0001>
module attributes {stable_mosaic.version = 11 : i64} {
  func.func @_conv1x1_bn_silu_kernel(%arg0: i32, %arg1: i32, %arg2: memref<1x4x256xbf16, #tpu.memory_space<vmem>>, %arg3: memref<8x4xbf16, #tpu.memory_space<vmem>>, %arg4: memref<8x1xf32, #tpu.memory_space<vmem>>, %arg5: memref<8x1xf32, #tpu.memory_space<vmem>>, %arg6: memref<1x8x256xf32, #tpu.memory_space<vmem>>) attributes {dimension_semantics = [#tpu.dimension_semantics<parallel>, #tpu.dimension_semantics<parallel>], iteration_bounds = array<i64: 2, 1>, scalar_prefetch = 0 : i64, scratch_operands = 0 : i64, tpu.core_type = #tpu.core_type<tc>, window_params = [{transform_indices = @transform_0, window_bounds = array<i64: 1, 4, 256>}, {pipeline_mode = #tpu.pipeline_mode<synchronous>, transform_indices = @transform_1, window_bounds = array<i64: 8, 4>}, {pipeline_mode = #tpu.pipeline_mode<synchronous>, transform_indices = @transform_2, window_bounds = array<i64: 8, 1>}, {pipeline_mode = #tpu.pipeline_mode<synchronous>, transform_indices = @transform_3, window_bounds = array<i64: 8, 1>}, {transform_indices = @transform_4, window_bounds = array<i64: 1, 8, 256>}]} {
    %c0 = arith.constant 0 : index
    %c0_0 = arith.constant 0 : index
    %0 = vector.load %arg3[%c0, %c0_0] : memref<8x4xbf16, #tpu.memory_space<vmem>>, vector<8x4xbf16>
    %c0_1 = arith.constant 0 : index
    %c0_2 = arith.constant 0 : index
    %c0_3 = arith.constant 0 : index
    %1 = vector.load %arg2[%c0_1, %c0_2, %c0_3] : memref<1x4x256xbf16, #tpu.memory_space<vmem>>, vector<1x4x256xbf16>
    %2 = vector.shape_cast %1 : vector<1x4x256xbf16> to vector<4x256xbf16>
    %cst = arith.constant dense<0.000000e+00> : vector<8x256xf32>
    %3 = tpu.matmul %0, %2, %cst {dimension_numbers = #tpu.dot_dimension_numbers<[1], [0], [0], [1], [0, 0, 1, 1], [], []>} : vector<8x4xbf16>, vector<4x256xbf16>, vector<8x256xf32> -> vector<8x256xf32>
    %c0_4 = arith.constant 0 : index
    %c0_5 = arith.constant 0 : index
    %4 = vector.load %arg4[%c0_4, %c0_5] : memref<8x1xf32, #tpu.memory_space<vmem>>, vector<8x1xf32>
    %5 = vector.broadcast %4 : vector<8x1xf32> to vector<8x256xf32>
    %6 = arith.mulf %3, %5 : vector<8x256xf32>
    %c0_6 = arith.constant 0 : index
    %c0_7 = arith.constant 0 : index
    %7 = vector.load %arg5[%c0_6, %c0_7] : memref<8x1xf32, #tpu.memory_space<vmem>>, vector<8x1xf32>
    %8 = vector.broadcast %7 : vector<8x1xf32> to vector<8x256xf32>
    %9 = arith.addf %6, %8 : vector<8x256xf32>
    %10 = arith.negf %9 : vector<8x256xf32>
    %11 = math.exp %10 : vector<8x256xf32>
    %cst_8 = arith.constant 1.000000e+00 : f32
    %12 = vector.broadcast %cst_8 : f32 to vector<8x256xf32>
    %13 = arith.addf %12, %11 : vector<8x256xf32>
    %14 = arith.divf %12, %13 : vector<8x256xf32>
    %15 = arith.mulf %9, %14 : vector<8x256xf32>
    %c0_9 = arith.constant 0 : index
    %c0_10 = arith.constant 0 : index
    %c0_11 = arith.constant 0 : index
    %16 = vector.load %arg6[%c0_9, %c0_10, %c0_11] : memref<1x8x256xf32, #tpu.memory_space<vmem>>, vector<1x8x256xf32>
    %17 = vector.shape_cast %16 : vector<1x8x256xf32> to vector<8x256xf32>
    %18 = vector.shape_cast %15 : vector<8x256xf32> to vector<1x8x256xf32>
    tpu.vector_store %arg6[%c0_9, %c0_10, %c0_11], %18 {strides = array<i32>} : memref<1x8x256xf32, #tpu.memory_space<vmem>>, vector<1x8x256xf32>,
    return
  }
  func.func @transform_0(%arg0: i32, %arg1: i32) -> (i32, i32, i32) {
    %c0_i32 = arith.constant 0 : i32
    %c0_i32_0 = arith.constant 0 : i32
    return %arg0, %c0_i32, %arg1 : i32, i32, i32
  }
  func.func @transform_1(%arg0: i32, %arg1: i32) -> (i32, i32) {
    %c0_i32 = arith.constant 0 : i32
    %c0_i32_0 = arith.constant 0 : i32
    %c0_i32_1 = arith.constant 0 : i32
    return %c0_i32, %c0_i32_0 : i32, i32
  }
  func.func @transform_2(%arg0: i32, %arg1: i32) -> (i32, i32) {
    %c0_i32 = arith.constant 0 : i32
    %c0_i32_0 = arith.constant 0 : i32
    %c0_i32_1 = arith.constant 0 : i32
    return %c0_i32, %c0_i32_0 : i32, i32
  }
  func.func @transform_3(%arg0: i32, %arg1: i32) -> (i32, i32) {
    %c0_i32 = arith.constant 0 : i32
    %c0_i32_0 = arith.constant 0 : i32
    %c0_i32_1 = arith.constant 0 : i32
    return %c0_i32, %c0_i32_0 : i32, i32
  }
  func.func @transform_4(%arg0: i32, %arg1: i32) -> (i32, i32, i32) {
    %c0_i32 = arith.constant 0 : i32
    %c0_i32_0 = arith.constant 0 : i32
    return %arg0, %c0_i32, %arg1 : i32, i32, i32
  }
}

</mosaic_0001>

<bundles_post_ra>
// kernel: conv1x1_bn_silu.1
= control target key start
LH: loop header
LB: loop body
LE: loop exit
PB: predicated region body
PF: predicated region fallthrough
CT: control target
= control target key end

     0   :  { %9 = vsyncpa [#allocation3], 0  ;;  %s729_s0 = inlined_call_operand.vmem [shape: bf16[2,4,256], index: 0, kind: input, shape index: {}]   ;;  %s730_s1 = inlined_call_operand.vmem [shape: bf16[8,4], index: 1, kind: input, shape index: {}]   ;;  %s731_s2 = inlined_call_operand.vmem [shape: f32[8,1], index: 2, kind: input, shape index: {}]   ;;  %s732_s3 = inlined_call_operand.vmem [shape: f32[8,1], index: 3, kind: input, shape index: {}]   ;;  %s733_s4 = inlined_call_operand.hbm [shape: f32[2,8,256], index: 4, kind: output, shape index: {}]  }
   0x1   :  { %11 = vsyncpa [#allocation3 + $0x1], 0  ;;  %s608_s15 = smov 0   ;;  %s610_s16 = smov 0  }
   0x2   :  { %s612_s17 = smov 0   ;;  %s614_s18 = smov 0  }
   0x3   :  { %s616_s19 = smov 0   ;;  %s618_s20 = smov 0  }
   0x4 LB: > { %s416_s21 = sadd.s32 4294967295, %s579_s20   ;;  %s417_s22 = sadd.s32 4294967294, %s579_s20   ;;  %s579_s20 = sphi %s618_s20, %s17_s20   ;;  %s575_s19 = sphi %s616_s19, %s740_s19   ;;  %s571_s18 = sphi %s614_s18, %s739_s18   ;;  %s567_s17 = sphi %s612_s17, %s738_s17   ;;  %s563_s16 = sphi %s610_s16, %s737_s16   ;;  %s559_s15 = sphi %s608_s15, %s736_s15  }
   0x5   : > { %s29_s23 = sadd.s32 1, %s575_s19  ;;  %s129_s24 = sadd.s32 1, %s567_s17 }
   0x6   : > { %p31_p0 = scmp.ge.s32.totalorder %s29_s23, 2  ;;  %p139_p1 = scmp.ne.s32.totalorder %s567_s17, %s563_s16 }
   0x7   : > { %p140_p2 = scmp.eq.s32.totalorder %s416_s21, 1  ;;  %p145_p3 = scmp.ne.s32.totalorder %s563_s16, %s559_s15 }
   0x8   : > { %s742_s23 = smov (%p31_p0, %s29_s23), 0  ;;  %p146_p5 = scmp.eq.s32.totalorder %s417_s22, 1 }
   0x9   : > { %p648_p4 = por %p140_p2, %p139_p1  ;;  %s124_s26 = ssub.s32 %s575_s19, %s742_s23 }
   0xa   : > { %p420_p6 = scmp.ge.s32.totalorder %s579_s20, 1  ;;  %p127_p7 = scmp.eq.s32.totalorder %s124_s26, 0 }
   0xb   : > { %p655_p8 = por %p146_p5, %p145_p3  ;;  %p186_p9 = scmp.lt.s32.totalorder %s579_s20, 3 }
   0xc   : > { %s661_s28 = scalar_select %p127_p7, %s567_s17, %s129_s24  }
   0xd   : > { %p187_p10 = pnand %p420_p6, %p186_p9 }
   0xe   : > { %p217_p11 = scmp.lt.s32.totalorder (!%p187_p10), %s571_s18, 1  ;;  %v581_v0 = vmov (!%p187_p10), 0   ;;  %v291_v1 = vld [vmem:[%s731_s2] sm:$0xff] (!%p187_p10)  ;;  %vm243_vm0 = vcmask (!%p187_p10), 1041408   ;;  %vm239_vm1 = vcmask (!%p187_p10), 31744   ;;  %s213_s14 = sand.u32 (!%p187_p10), 1, %s563_s16  }
   0xf   : > { %190 = sbr.rel (%p187_p10) target bundleno = 292 (0x124), region = 36  ;;  %282 = vmatprep.mubr.bf16.mxu0 (!%p187_p10), %v581_v0  ;;  %492 = vset.pattern.permute.xlu0 (!%p187_p10), %v581_v0  ;;  %v299_v2 = vld [vmem:[%s732_s3] sm:$0xff] (!%p187_p10)  ;;  %s421_s21 = sshll.u32 (!%p187_p10), %s213_s14, 4 }
  0x10   : > { %294 = vperm.xlu0 (!%p187_p10), %492, %v291_v1   ;;  %v228_v6 = vld [vmem:[%s730_s1] sm:$0xf] (!%p187_p10)  ;;  %s435_s22 = sshll.u32 (!%p187_p10), %s571_s18, 8  ;;  %s215_s24 = scalar_lea.vmem (!%p187_p10), [#allocation2], %s421_s21 }
  0x11   : > { %s340_s26 = sshll.u32 (!%p187_p10), %s215_s24, 4  ;;  %s324_s6 = scalar_lea.sflag (!%p187_p10), [#allocation3], %s213_s14  ;;  %s684_s26 = int_to_ptr.vmem [resolvable:$true] %s340_s26 }
  0x12   : > { %s582_s7 = smov (!%p187_p10), [#allocation2]  }
  0x14   : > { %302 = vperm.xlu0 (!%p187_p10), %492, %v299_v2  }
  0x16   : > { %s218_s5 = scalar_select %p217_p11, %s571_s18, 1 }
  0x17   : > { %s501_s18 = scalar_lea.vmem %s684_s26, 256 }
  0x18   : > { %s434_s8 = sshll.u32 %s218_s5, 2  ;;  %s682_s5 = scalar_lea.hbm %s733_s4, %s435_s22 }
  0x19   : > { %s224_s11 = scalar_lea.vmem %s729_s0, %s434_s8  ;;  %p502_p12 = scmp.ne.s32.totalorder %s684_s26, %s501_s18 }
  0x1a   : > { %v424_v3 = vld.sshfl [vmem:[%s224_s11] sm:$0x33 pattern:$0x76325410]  ;;  %s505_s8 = sshll.u32 %s582_s7, 4  ;;  %s506_s8 = int_to_ptr.vmem [resolvable:$false] %s505_s8 }
  0x1b   : > { %v238_v4 = vcombine.high %v424_v3, %v424_v3  ;;  %v245_v5 = vsel %vm243_vm0, %v424_v3, 0  ;;  %p503_p13 = pnand %p502_p12, %p648_p4  ;;  %s507_s9 = scalar_lea.vmem %s506_s8, 512 }
  0x1c   : > { %p508_p1 = scmp.lt.s32.totalorder %s684_s26, %s506_s8  ;;  %p509_p2 = scmp.lt.s32.totalorder %s507_s9, %s501_s18 }
  0x1d   : > { %425 = vmatprep.subr.msk.bf16.mxu0 %vm243_vm0, %v238_v4  ;;  %p504_p0 = pneg %p503_p13 }
  0x1e   : > { %251 = vmatpush1.bf16.msra.mxu0 %v245_v5  ;;  %p510_p3 = por %p509_p2, %p508_p1 }
  0x20   : > { %p511_p5 = pnand %p510_p3, %p504_p0 }
  0x21   : > { %426 = vmatmul.mubr.msk.bf16.vlgmr.msra.gmra.mrb[0].mxu0 %vm239_vm1, %v228_v6 }
  0x8f   : > { %v295_v7 = vpop.permute.xlu0 %294 }
  0x93   : > { %v303_v11 = vpop.permute.xlu0 %302 }
  0xf4   : > { %v284_v8 = vpop.f32.mrb[0].mxu0 }
  0xf5   : > { %v297_v9 = vmul.f32 %v295_v7, %v284_v8  ;;  %v286_v10 = vpop.f32.mrb[1].mxu0 }
  0xf6   : > { %v298_v12 = vmul.f32 %v295_v7, %v286_v10  ;;  %v288_v13 = vpop.f32.mrb[2].mxu0 }
  0xf7   : > { %v305_v14 = vadd.f32 %v303_v11, %v297_v9  ;;  %v289_v15 = vpop.f32.mrb[3].mxu0 }
  0xf8   : > { %v306_v16 = vadd.f32 %v303_v11, %v298_v12 }
  0xf9   : > { %v427_v17 = vmul.f32 -1.442695, %v305_v14 }
  0xfa   : > { %v428_v18 = vmul.f32 -1.442695, %v306_v16 }
  0xfb   : > { %493 = vpow2.f32 %v427_v17 }
  0xfc   : > { %495 = vpow2.f32 %v428_v18 }
 0x105   : > { %v494_v19 = vpop.eup %493 }
 0x106   : > { %v496_v20 = vpop.eup %495  ;;  %v313_v21 = vadd.f32 1.0, %v494_v19 }
 0x107   : > { %v314_v22 = vadd.f32 1.0, %v496_v20 }
 0x108   : > { %497 = vrcp.f32 %v313_v21 }
 0x109   : > { %499 = vrcp.f32 %v314_v22 }
 0x112   : > { %v498_v23 = vpop.eup %497 }
 0x113   : > { %v500_v24 = vpop.eup %499  ;;  %v319_v25 = vmul.f32 %v498_v23, %v305_v14 }
 0x114   : > { %v320_v26 = vmul.f32 %v500_v24, %v306_v16 }
 0x115   : > { %321 = vst [vmem:[%s215_s24] sm:$0xff] %v319_v25 }
 0x116   : > { %322 = vst [vmem:[%s215_s24 + $0x8] sm:$0xff] %v320_v26 }
 0x117   : > { %514 = shalt.err (!%p511_p5)
}
 0x118   : > { %s515_s10 = scalar_lea.hbm %s682_s5, 256  ;;  %s519_s13 = scalar_lea.hbm %s733_s4, 512 }
 0x119   : > { %p516_p6 = scmp.ne.s32.totalorder %s682_s5, %s515_s10  ;;  %p520_p10 = scmp.lt.u32.totalorder %s682_s5, %s733_s4 }
 0x11a   : > { %p521_p11 = scmp.lt.u32.totalorder %s519_s13, %s515_s10  ;;  %p523_p13 = scmp.lt.u32.totalorder %s515_s10, %s682_s5 }
 0x11b   : > { %p517_p7 = pnand %p516_p6, %p648_p4 }
 0x11c   : > { %p522_p12 = por %p521_p11, %p520_p10 }
 0x11d   : > { %p518_p9 = pneg %p517_p7 }
 0x11e   : > { %p524_p0 = por %p523_p13, %p522_p12 }
 0x120   : > { %p525_p1 = pnand %p524_p0, %p518_p9 }
 0x122   : > { %528 = shalt.err (!%p525_p1)
}
 0x123   : > { %436 = dma.vmem_to_hbm [thread:$0]  (%p648_p4), %s684_s26, 256, %s682_s5, %s324_s6  }
 0x124 PF: > { %p442_p2 = scmp.ge.s32.totalorder %s579_s20, 2  ;;  %s352_s22 = sand.u32 1, %s559_s15  }
 0x125   : > { %s353_s24 = scalar_lea.sflag [#allocation3], %s352_s22 }
 0x126   : > { %p439_p3 = pnand %p442_p2, %p655_p8 }
 0x128   : > { %554 = dma.done.wait (!%p439_p3), %s353_s24, 256  }
 0x129   : > { %556 = vsyncadd (!%p439_p3), %s353_s24, 4294967040  ;;  %s17_s20 = sadd.s32 1, %s579_s20   ;;  %s736_s15 = smov %s563_s16 }
 0x12a   : > { %p14_p5 = scmp.ge.s32.totalorder %s17_s20, 4   ;;  %s737_s16 = smov %s567_s17 }
 0x12b   : > { %s738_s17 = smov %s661_s28  ;;  %s739_s18 = smov %s575_s19 }
 0x12c   : > { %s740_s19 = smov %s742_s23  ;;  %16 = sbr.rel (!%p14_p5) target bundleno = 4 (0x4), region = 71 }
 0x133   :  { %358 = vsyncpa [#allocation3], 1 }
 0x134   :  { %360 = vsyncpa [#allocation3 + $0x1], 1 }

</bundles_post_ra>
